<compile_context>
chip_gen: v7x
topology: tpu7x:2x2x1
jax: 0.10.0
libtpu: 0.0.40
codegen_flags: <defaults>
</compile_context>

<pallas_src>
import jax
import jax.numpy as jnp
from jax.experimental import pallas as pl
from jax.experimental.pallas import tpu as pltpu


def _normalizer_kernel(mean_ref, inv_std_ref, x_ref, o_ref):
    # mean_ref / inv_std_ref: (C,) f32 scalars in SMEM
    # x_ref / o_ref: (1, 1, BS, 128) VMEM tile of the current (n, c, spatial-chunk)
    c = pl.program_id(1)
    m = mean_ref[c]
    inv = inv_std_ref[c]
    o_ref[...] = ((x_ref[...] - m) * inv).astype(o_ref.dtype)


def normalize(x: jax.Array, mean: jax.Array, std: jax.Array) -> jax.Array:
    """(x - mean[c]) / std[c] with per-channel broadcast, NCHW input."""
    N, C, H, W = x.shape
    assert mean.shape == (C,) and std.shape == (C,)

    LANE = 128
    SUB_TARGET = 4096  # 4096 sublanes * 128 lanes * 4 B = 2 MiB f32 per input tile

    HW = H * W
    s_raw = -(-HW // LANE)                   # ceil(HW / 128) sublanes of real data
    n_chunks = -(-s_raw // SUB_TARGET)       # spatial grid extent (>= 1)
    bs = -(-s_raw // n_chunks)               # sublanes per block
    bs = ((bs + 7) // 8) * 8                 # sublane count must be a multiple of 8
    S = n_chunks * bs                        # padded sublane extent
    HW_pad = S * LANE

    # Flatten spatial dims; pad up to the tiled extent (zeros, sliced off afterwards).
    xf = x.reshape(N, C, HW)
    if HW_pad != HW:
        xf = jnp.pad(xf, ((0, 0), (0, 0), (0, HW_pad - HW)))
    xt = xf.reshape(N, C, S, LANE)

    mean_f32 = mean.astype(jnp.float32)
    inv_std = (1.0 / std).astype(jnp.float32)  # scalar reciprocal, computed once

    out = pl.pallas_call(
        _normalizer_kernel,
        out_shape=jax.ShapeDtypeStruct((N, C, S, LANE), x.dtype),
        grid=(N, C, n_chunks),
        in_specs=[
            pl.BlockSpec(memory_space=pltpu.MemorySpace.SMEM),   # mean (C,)
            pl.BlockSpec(memory_space=pltpu.MemorySpace.SMEM),   # 1/std (C,)
            pl.BlockSpec((1, 1, bs, LANE), lambda n, c, s: (n, c, s, 0)),
        ],
        out_specs=pl.BlockSpec((1, 1, bs, LANE), lambda n, c, s: (n, c, s, 0)),
        compiler_params=pltpu.CompilerParams(
            dimension_semantics=("parallel", "parallel", "parallel")
        ),
    )(mean_f32, inv_std, xt)

    out = out.reshape(N, C, HW_pad)
    if HW_pad != HW:
        out = out[:, :, :HW]
    return out.reshape(N, C, H, W)


class Normalizer:
    """JAX/Pallas port of unipercept Normalizer: (image - mean) / std, per-channel."""

    def __init__(self, mean, std):
        # Matches torch.tensor(mean).view(-1,1,1) semantics; stored flat (C,)
        self.mean = jnp.asarray(mean, dtype=jnp.float32)
        self.std = jnp.asarray(std, dtype=jnp.float32)
        assert self.mean.shape == self.std.shape, (
            f"{self.mean} and {self.std} have different shapes!"
        )

    def __call__(self, x: jax.Array) -> jax.Array:
        return normalize(x, self.mean, self.std)


if __name__ == "__main__":
    key = jax.random.PRNGKey(0)
    N, C, H, W = 2, 4, 16, 16
    x = jax.random.normal(key, (N, C, H, W), dtype=jnp.float32) * 3.0 + 1.5

    # Deterministic per-channel normalization constants (C = 4)
    mean = [0.485, 0.456, 0.406, 0.5]
    std = [0.229, 0.224, 0.225, 0.25]

    norm = Normalizer(mean, std)
    out = norm(x)
    out = jax.block_until_ready(out)

    # Reference check (plain JAX broadcasting, same as PyTorch view(-1,1,1))
    ref = (x - norm.mean[:, None, None]) / norm.std[:, None, None]
    assert out.shape == x.shape and out.dtype == x.dtype
    # rtol/atol slightly looser than f32 ulp to absorb the (x-m)*inv_std vs (x-m)/std delta
    assert jnp.allclose(out, ref, rtol=1e-5, atol=1e-5)

    print("KERNEL_OK")
</pallas_src>

<mosaic_0001>
module attributes {stable_mosaic.version = 11 : i64} {
  func.func @_normalizer_kernel(%arg0: i32, %arg1: i32, %arg2: i32, %arg3: memref<4xf32, #tpu.memory_space<smem>>, %arg4: memref<4xf32, #tpu.memory_space<smem>>, %arg5: memref<1x1x8x128xf32, #tpu.memory_space<vmem>>, %arg6: memref<1x1x8x128xf32, #tpu.memory_space<vmem>>) attributes {dimension_semantics = [#tpu.dimension_semantics<parallel>, #tpu.dimension_semantics<parallel>, #tpu.dimension_semantics<parallel>], iteration_bounds = array<i64: 2, 4, 1>, scalar_prefetch = 0 : i64, scratch_operands = 0 : i64, tpu.core_type = #tpu.core_type<tc>, window_params = [{transform_indices = @transform_0, window_bounds = array<i64: 4>}, {transform_indices = @transform_1, window_bounds = array<i64: 4>}, {transform_indices = @transform_2, window_bounds = array<i64: 1, 1, 8, 128>}, {transform_indices = @transform_3, window_bounds = array<i64: 1, 1, 8, 128>}]} {
    %0 = arith.index_cast %arg1 : i32 to index
    %1 = memref.load %arg3[%0] : memref<4xf32, #tpu.memory_space<smem>>
    %2 = arith.index_cast %arg1 : i32 to index
    %3 = memref.load %arg4[%2] : memref<4xf32, #tpu.memory_space<smem>>
    %c0 = arith.constant 0 : index
    %c0_0 = arith.constant 0 : index
    %c0_1 = arith.constant 0 : index
    %c0_2 = arith.constant 0 : index
    %4 = vector.load %arg5[%c0, %c0_0, %c0_1, %c0_2] : memref<1x1x8x128xf32, #tpu.memory_space<vmem>>, vector<1x1x8x128xf32>
    %5 = vector.broadcast %1 : f32 to vector<1x1x8x128xf32>
    %6 = arith.subf %4, %5 : vector<1x1x8x128xf32>
    %7 = vector.broadcast %3 : f32 to vector<1x1x8x128xf32>
    %8 = arith.mulf %6, %7 : vector<1x1x8x128xf32>
    %c0_3 = arith.constant 0 : index
    %c0_4 = arith.constant 0 : index
    %c0_5 = arith.constant 0 : index
    %c0_6 = arith.constant 0 : index
    %9 = vector.load %arg6[%c0_3, %c0_4, %c0_5, %c0_6] : memref<1x1x8x128xf32, #tpu.memory_space<vmem>>, vector<1x1x8x128xf32>
    tpu.vector_store %arg6[%c0_3, %c0_4, %c0_5, %c0_6], %8 {strides = array<i32>} : memref<1x1x8x128xf32, #tpu.memory_space<vmem>>, vector<1x1x8x128xf32>,
    return
  }
  func.func @transform_0(%arg0: i32, %arg1: i32, %arg2: i32) -> i32 {
    %c0_i32 = arith.constant 0 : i32
    %c0_i32_0 = arith.constant 0 : i32
    return %c0_i32 : i32
  }
  func.func @transform_1(%arg0: i32, %arg1: i32, %arg2: i32) -> i32 {
    %c0_i32 = arith.constant 0 : i32
    %c0_i32_0 = arith.constant 0 : i32
    return %c0_i32 : i32
  }
  func.func @transform_2(%arg0: i32, %arg1: i32, %arg2: i32) -> (i32, i32, i32, i32) {
    %c0_i32 = arith.constant 0 : i32
    %c0_i32_0 = arith.constant 0 : i32
    return %arg0, %arg1, %arg2, %c0_i32 : i32, i32, i32, i32
  }
  func.func @transform_3(%arg0: i32, %arg1: i32, %arg2: i32) -> (i32, i32, i32, i32) {
    %c0_i32 = arith.constant 0 : i32
    %c0_i32_0 = arith.constant 0 : i32
    return %arg0, %arg1, %arg2, %c0_i32 : i32, i32, i32, i32
  }
}

</mosaic_0001>

<bundles_post_ra>
// kernel: tpu_custom_call.1
= control target key start
LH: loop header
LB: loop body
LE: loop exit
PB: predicated region body
PF: predicated region fallthrough
CT: control target
= control target key end

     0   :  { %s935_s0 = inlined_call_operand.hbm [shape: f32[4], index: 0, kind: input, shape index: {}]   ;;  %s936_s1 = inlined_call_operand.vmem [shape: f32[4], index: 1, kind: input, shape index: {}]   ;;  %s937_s2 = inlined_call_operand.hbm [shape: f32[2,4,8,128], index: 2, kind: input, shape index: {}]   ;;  %s938_s3 = inlined_call_operand.hbm [shape: f32[2,4,8,128], index: 3, kind: output, shape index: {}]  }
   0x1   :  { %945 = sst [smem:[#allocation16_spill]] %s935_s0 }
   0x2   :  { %946 = sst [smem:[#allocation17_spill]] %s936_s1 }
   0x3   :  { %8 = vsyncpa [#allocation5], 0 }
   0x4   :  { %9 = vsyncpa [#allocation6], 0 }
   0x5   :  { %10 = vsyncpa [#allocation3], 0 }
   0x6   :  { %12 = vsyncpa [#allocation3 + $0x1], 0 }
   0x7   :  { %13 = vsyncpa [#allocation4], 0 }
   0x8   :  { %15 = vsyncpa [#allocation4 + $0x1], 0  ;;  %s688_s12 = smov 0   ;;  %s690_s13 = smov 0  }
   0x9   :  { %s692_s14 = smov 0   ;;  %s694_s15 = smov 0  }
   0xa   :  { %s696_s16 = smov 0   ;;  %s698_s17 = smov 0  }
   0xb   :  { %s700_s18 = smov 0   ;;  %s702_s19 = smov 0  }
   0xc LB: > { %s380_s20 = sadd.s32 4294967295, %s662_s19   ;;  %s381_s21 = sadd.s32 4294967294, %s662_s19   ;;  %s662_s19 = sphi %s702_s19, %s21_s19   ;;  %s658_s18 = sphi %s700_s18, %s971_s18   ;;  %s654_s17 = sphi %s698_s17, %s970_s17   ;;  %s650_s16 = sphi %s696_s16, %s969_s16   ;;  %s646_s15 = sphi %s694_s15, %s968_s15   ;;  %s642_s14 = sphi %s692_s14, %s967_s14   ;;  %s638_s13 = sphi %s690_s13, %s966_s13   ;;  %s634_s12 = sphi %s688_s12, %s965_s12  }
   0xd   : > { %p106_p0 = scmp.ne.s32.totalorder %s638_s13, %s634_s12  ;;  %p734_p1 = scmp.eq.s32.totalorder %s380_s20, 0 }
   0xe   : > { %p140_p2 = scmp.eq.s32.totalorder %s381_s21, 7  ;;  %p382_p4 = scmp.ge.s32.totalorder %s662_s19, 1 }
   0xf   : > { %s947_s22 = scalar_select %p734_p1, 1, 0 }
  0x10   : > { %p740_p3 = por %p734_p1, %p106_p0  ;;  %p745_p5 = por %p140_p2, %p106_p0 }
  0x11   : > { %p147_p6 = scmp.lt.s32.totalorder %s662_s19, 9  ;;  %s952_s1 = sld [smem:[#allocation17_spill]] }
  0x12   : > { %s948_s23 = scalar_select %p740_p3, 1, 0 }
  0x13   : > { %s949_s24 = scalar_select %p745_p5, 1, 0 }
  0x14   : > { %p750_p7 = pnand %p382_p4, %p147_p6  ;;  %s954_s0 = sld [smem:[#allocation16_spill]] }
  0x15   : > { %950 = sst [smem:[#allocation14_spill]] %s949_s24 }
  0x16   : > { %p411_p8 = pneg %p750_p7 }
  0x17   : > { %s169_s28 = sshll.u32 %s952_s1, 4  ;;  %s170_s28 = int_to_ptr.vmem [resolvable:$true] %s169_s28 }
  0x18   : > { %p761_p9 = pnand %p411_p8, %p734_p1 }
  0x1a   : > { %s498_s5 = scalar_lea.hbm %s954_s0, 16  ;;  %p500_p11 = pneg %p761_p9 }
  0x1b   : > { %p499_p10 = scmp.ne.s32.totalorder %s954_s0, %s498_s5  ;;  %p505_p0 = scmp.lt.u32.totalorder %s498_s5, %s954_s0 }
  0x1d   : > { %p501_p12 = pnand %p500_p11, %p499_p10 }
  0x1f   : > { %p502_p13 = pneg %p501_p12 }
  0x21   : > { %p507_p2 = pnand %p505_p0, %p502_p13 }
  0x23   : > { %510 = shalt.err (!%p507_p2)
}
  0x24   : > { %s664_s10 = smov [#allocation2]   ;;  %s511_s26 = scalar_lea.vmem %s170_s28, 16 }
  0x25   : > { %414 = dma.hbm_to_smem (!%p761_p9), %s954_s0, 16, %s664_s10, [#allocation5]  }
  0x26   : > { %p512_p4 = scmp.ne.s32.totalorder %s170_s28, %s511_s26  ;;  %p519_p5 = scmp.lt.s32.totalorder %s170_s28, %s170_s28 }
  0x27   : > { %p520_p10 = scmp.lt.s32.totalorder %s511_s26, %s511_s26 }
  0x28   : > { %p514_p6 = pnand %p512_p4, %p500_p11 }
  0x29   : > { %p521_p12 = por %p520_p10, %p519_p5 }
  0x2a   : > { %p515_p8 = pneg %p514_p6 }
  0x2c   : > { %p522_p3 = pnand %p521_p12, %p515_p8 }
  0x2e   : > { %525 = shalt.err (!%p522_p3)
}
  0x2f   : > { %s665_s27 = smov [#allocation7]   ;;  %p134_p11 = scmp.eq.s32.totalorder %s380_s20, 7 }
  0x30   : > { %417 = dma.vmem_to_smem (!%p761_p9), %s170_s28, 16, %s665_s27, [#allocation6]  }
  0x31   : > { %s36_s30 = sadd.s32 1, %s654_s17  ;;  %s40_s4 = sadd.s32 1, %s658_s18 }
  0x32   : > { %p38_p3 = scmp.ge.s32.totalorder %s36_s30, 4  ;;  %p100_p5 = scmp.ne.s32.totalorder %s642_s14, %s638_s13 }
  0x33   : > { %p101_p13 = scmp.eq.s32.totalorder %s662_s19, 0  ;;  %s93_s5 = sadd.s32 1, %s642_s14 }
  0x34   : > { %s973_s30 = smov (%p38_p3, %s36_s30), 0  ;;  %s975_s4 = smov (!%p38_p3, %s40_s4), %s658_s18 }
  0x35   : > { %955 = sst [smem:[#allocation15_spill]] %s973_s30  ;;  %s87_s29 = ssub.s32 %s654_s17, %s973_s30 }
  0x36   : > { %p42_p0 = scmp.ge.s32.totalorder %s975_s4, 2  ;;  %p796_p9 = por %p134_p11, %p100_p5 }
  0x37   : > { %p800_p2 = por %p101_p13, %p100_p5  ;;  %s180_s6 = sand.u32 1, %s642_s14  }
  0x38   : > { %s956_s28 = scalar_select %p796_p9, 1, 0 }
  0x39   : > { %s977_s4 = smov (%p42_p0, %s975_s4), 0  ;;  %p428_p4 = scmp.lt.s32.totalorder %s662_s19, 8 }
  0x3a   : > { %s386_s7 = sshll.u32 %s180_s6, 3  ;;  %s86_s8 = ssub.s32 %s658_s18, %s977_s4 }
  0x3b   : > { %s88_s9 = sor.u32 %s87_s29, %s86_s8  ;;  %s387_s10 = sshll.u32 %s658_s18, 2 }
  0x3c   : > { %p91_p6 = scmp.eq.s32.totalorder %s88_s9, 0  ;;  %s190_s11 = sadd.s32 %s654_s17, %s387_s10 }
  0x3d   : > { %s388_s21 = sshll.u32 %s190_s11, 7  ;;  %s184_s26 = scalar_lea.vmem [#allocation8], %s386_s7 }
  0x3e   : > { %s194_s27 = sshll.u32 %s184_s26, 4  ;;  %s818_s24 = scalar_lea.hbm %s937_s2, %s388_s21  ;;  %s820_s27 = int_to_ptr.vmem [resolvable:$true] %s194_s27 }
  0x3f   : > { %s813_s0 = scalar_select %p91_p6, %s642_s14, %s93_s5  }
  0x40   : > { %p826_p8 = pnand %p428_p4, %p800_p2  ;;  %s181_s5 = scalar_lea.sflag [#allocation3], %s180_s6 }
  0x41   : > { %s526_s7 = scalar_lea.hbm %s818_s24, 128  ;;  %s531_s20 = scalar_lea.hbm %s937_s2, 1024 }
  0x42   : > { %p527_p10 = scmp.ne.s32.totalorder %s818_s24, %s526_s7  ;;  %p528_p12 = pneg %p826_p8 }
  0x43   : > { %p532_p5 = scmp.lt.u32.totalorder %s818_s24, %s937_s2  ;;  %p533_p13 = scmp.lt.u32.totalorder %s531_s20, %s526_s7 }
  0x44   : > { %p529_p11 = pnand %p528_p12, %p527_p10  ;;  %p535_p2 = scmp.lt.u32.totalorder %s526_s7, %s818_s24 }
  0x45   : > { %p534_p0 = por %p533_p13, %p532_p5 }
  0x46   : > { %p530_p3 = pneg %p529_p11 }
  0x47   : > { %p536_p4 = por %p535_p2, %p534_p0 }
  0x49   : > { %p537_p6 = pnand %p536_p4, %p530_p3 }
  0x4b   : > { %540 = shalt.err (!%p537_p6)
}
  0x4c   : > { %s541_s6 = scalar_lea.vmem %s820_s27, 128  ;;  %s666_s10 = smov [#allocation8]  }
  0x4d   : > { %p542_p10 = scmp.ne.s32.totalorder %s820_s27, %s541_s6  ;;  %s546_s11 = sshll.u32 %s666_s10, 4  ;;  %s547_s11 = int_to_ptr.vmem [resolvable:$false] %s546_s11 }
  0x4e   : > { %s548_s21 = scalar_lea.vmem %s547_s11, 256  ;;  %p549_p1 = scmp.lt.s32.totalorder %s820_s27, %s547_s11 }
  0x4f   : > { %p544_p11 = pnand %p542_p10, %p528_p12  ;;  %p550_p5 = scmp.lt.s32.totalorder %s548_s21, %s541_s6 }
  0x51   : > { %p545_p9 = pneg %p544_p11  ;;  %p551_p13 = por %p550_p5, %p549_p1 }
  0x53   : > { %p552_p0 = pnand %p551_p13, %p545_p9 }
  0x55   : > { %555 = shalt.err (!%p552_p0)
}
  0x56   : > { %421 = dma.hbm_to_vmem [thread:$0]  (!%p826_p8), %s818_s24, 128, %s820_s27, %s181_s5  }
  0x57   : > { %203 = sbr.rel (%p750_p7) target bundleno = 131 (0x83), region = 32  ;;  %p959_p12 = scmp.ne.s32.totalorder (!%p750_p7), %s947_s22, 0 }
  0x5e   : > { %617 = dma.done.wait (%p959_p12), [#allocation5], 16  }
  0x5f   : > { %619 = vsyncadd (%p959_p12), [#allocation5], 4294967280 }
  0x60   : > { %621 = dma.done.wait (%p959_p12), [#allocation6], 16  }
  0x61   : > { %623 = vsyncadd (%p959_p12), [#allocation6], 4294967280  ;;  %s866_s26 = sand.u32 1, %s638_s13   ;;  %p960_p1 = scmp.ne.s32.totalorder %s948_s23, 0 }
  0x62   : > { %s392_s24 = sshll.u32 %s866_s26, 3  ;;  %s214_s25 = scalar_lea.sflag [#allocation3], %s866_s26 }
  0x63   : > { %s217_s27 = scalar_lea.vmem [#allocation8], %s392_s24 }
  0x64   : > { %625 = dma.done.wait (%p960_p1), %s214_s25, 128  }
  0x65   : > { %627 = vsyncadd (%p960_p1), %s214_s25, 4294967168 }
  0x66   : > { %222 = sfence }
  0x67   : > { %s241_s22 = sld [smem:[#allocation2 + %s646_s15]]  ;;  %s395_s5 = sshll.u32 %s650_s16, 2  ;;  %v243_v0 = vld [vmem:[%s217_s27] sm:$0xff] }
  0x68   : > { %s242_s29 = sld [smem:[#allocation7 + %s646_s15]]  ;;  %s262_s7 = sadd.s32 %s646_s15, %s395_s5 }
  0x69   : > { %s240_s1 = scalar_lea.vmem [#allocation9], %s392_s24  ;;  %s396_s20 = sshll.u32 %s262_s7, 7 }
  0x6a   : > { %s266_s30 = sshll.u32 %s240_s1, 4  ;;  %s883_s9 = scalar_lea.hbm %s938_s3, %s396_s20  ;;  %s878_s30 = int_to_ptr.vmem [resolvable:$true] %s266_s30 }
  0x6b   : > { %s250_s16 = scalar_lea.sflag [#allocation4], %s866_s26  ;;  %s556_s15 = scalar_lea.vmem %s878_s30, 128 }
  0x6c   : > { %p557_p7 = scmp.ne.s32.totalorder %s878_s30, %s556_s15  ;;  %p961_p9 = scmp.ne.s32.totalorder %s956_s28, 0 }
  0x6d   : > { %v244_v1 = vstv %s241_s22  ;;  %s667_s6 = smov [#allocation9]  }
  0x6e   : > { %v245_v2 = vsub.f32 %v243_v0, %v244_v1  ;;  %v246_v3 = vstv %s242_s29  ;;  %p558_p8 = pnand %p557_p7, %p961_p9  ;;  %s560_s10 = sshll.u32 %s667_s6, 4  ;;  %s561_s10 = int_to_ptr.vmem [resolvable:$false] %s560_s10 }
  0x6f   : > { %s562_s11 = scalar_lea.vmem %s561_s10, 256  ;;  %p563_p2 = scmp.lt.s32.totalorder %s878_s30, %s561_s10 }
  0x70   : > { %v247_v4 = vmul.f32 %v246_v3, %v245_v2  ;;  %p559_p3 = pneg %p558_p8  ;;  %p564_p4 = scmp.lt.s32.totalorder %s562_s11, %s556_s15 }
  0x72   : > { %248 = vst [vmem:[%s240_s1] sm:$0xff] %v247_v4  ;;  %p565_p6 = por %p564_p4, %p563_p2 }
  0x74   : > { %p566_p10 = pnand %p565_p6, %p559_p3 }
  0x76   : > { %569 = shalt.err (!%p566_p10)
}
  0x77   : > { %s570_s21 = scalar_lea.hbm %s883_s9, 128  ;;  %s574_s25 = scalar_lea.hbm %s938_s3, 1024 }
  0x78   : > { %p571_p11 = scmp.ne.s32.totalorder %s883_s9, %s570_s21  ;;  %p575_p0 = scmp.lt.u32.totalorder %s883_s9, %s938_s3 }
  0x79   : > { %p576_p12 = scmp.lt.u32.totalorder %s574_s25, %s570_s21  ;;  %p578_p7 = scmp.lt.u32.totalorder %s570_s21, %s883_s9 }
  0x7a   : > { %p572_p5 = pnand %p571_p11, %p961_p9 }
  0x7b   : > { %p577_p1 = por %p576_p12, %p575_p0 }
  0x7c   : > { %p573_p13 = pneg %p572_p5 }
  0x7d   : > { %p579_p8 = por %p578_p7, %p577_p1 }
  0x7f   : > { %p580_p3 = pnand %p579_p8, %p573_p13 }
  0x81   : > { %583 = shalt.err (!%p580_p3)
}
  0x82   : > { %409 = dma.vmem_to_hbm [thread:$0]  (%p961_p9), %s878_s30, 128, %s883_s9, %s250_s16  }
  0x83 PF: > { %s962_s29 = sld [smem:[#allocation14_spill]]  ;;  %p431_p2 = scmp.ge.s32.totalorder %s662_s19, 2 }
  0x84   : > { %s278_s5 = sand.u32 1, %s634_s12  }
  0x85   : > { %s279_s7 = scalar_lea.sflag [#allocation4], %s278_s5 }
  0x89   : > { %p963_p4 = scmp.ne.s32.totalorder %s962_s29, 0 }
  0x8b   : > { %p423_p6 = pnand %p431_p2, %p963_p4 }
  0x8d   : > { %629 = dma.done.wait (!%p423_p6), %s279_s7, 128  }
  0x8e   : > { %631 = vsyncadd (!%p423_p6), %s279_s7, 4294967168  ;;  %s21_s19 = sadd.s32 1, %s662_s19   ;;  %s964_s28 = sld [smem:[#allocation15_spill]] }
  0x8f   : > { %p18_p10 = scmp.ge.s32.totalorder %s21_s19, 10   ;;  %s965_s12 = smov %s638_s13 }
  0x90   : > { %s966_s13 = smov %s642_s14  ;;  %s967_s14 = smov %s813_s0 }
  0x91   : > { %s968_s15 = smov %s654_s17  ;;  %s969_s16 = smov %s658_s18 }
  0x92   : > { %s971_s18 = smov %s977_s4  ;;  %20 = sbr.rel (!%p18_p10) target bundleno = 12 (0xc), region = 87 }
  0x94   : > { %s970_s17 = smov %s964_s28 }
  0x99   :  { %284 = vsyncpa [#allocation3], 1 }
  0x9a   :  { %286 = vsyncpa [#allocation3 + $0x1], 1 }
  0x9b   :  { %287 = vsyncpa [#allocation4], 1 }
  0x9c   :  { %289 = vsyncpa [#allocation4 + $0x1], 1 }
  0x9d   :  { %290 = vsyncpa [#allocation5], 1 }
  0x9e   :  { %292 = vsyncpa [#allocation5 + $0x1], 1 }
  0x9f   :  { %293 = vsyncpa [#allocation6], 1 }
  0xa0   :  { %295 = vsyncpa [#allocation6 + $0x1], 1 }

</bundles_post_ra>
